<compile_context>
chip_gen: v6e
topology: v6e:2x2x1
jax: 0.10.0
libtpu: 0.0.40
codegen_flags: <defaults>
</compile_context>

<pallas_src>
import functools

import jax
import jax.numpy as jnp
from jax.experimental import pallas as pl
from jax.experimental.pallas import tpu as pltpu


def _round_up(x, m):
    return ((x + m - 1) // m) * m


def fcdp_kernel(x_ref, w1_ref, b1_ref, w2_ref, b2_ref, w3_ref, b3_ref,
                scale_ref, offset_ref, out_ref):
    x = x_ref[...]

    # input layer + relu
    h = jnp.dot(x, w1_ref[...], preferred_element_type=jnp.float32) + b1_ref[...]
    h = jnp.maximum(h, 0.0)

    # hidden layer + relu
    h = jnp.dot(h, w2_ref[...], preferred_element_type=jnp.float32) + b2_ref[...]
    h = jnp.maximum(h, 0.0)

    # output layer (exactly action_dim columns) + tanh
    a = jnp.dot(h, w3_ref[...], preferred_element_type=jnp.float32) + b3_ref[...]
    a = jnp.tanh(a)

    # rescale folded into one FMA: (a + 1)*(max-min)/2 + min == a*scale + offset
    out_ref[...] = a * scale_ref[...] + offset_ref[...]


def prepare_params(params, env_min, env_max):
    """One-time prep outside the per-call path: bias reshapes + folded rescale consts."""
    w1, b1, w2, b2, w3, b3 = params
    action_dim = w3.shape[1]
    scale = ((env_max - env_min) * 0.5).astype(jnp.float32).reshape(1, action_dim)
    offset = ((env_max + env_min) * 0.5).astype(jnp.float32).reshape(1, action_dim)
    return (w1.astype(jnp.float32), b1.reshape(1, -1).astype(jnp.float32),
            w2.astype(jnp.float32), b2.reshape(1, -1).astype(jnp.float32),
            w3.astype(jnp.float32), b3.reshape(1, -1).astype(jnp.float32),
            scale, offset)


@functools.partial(jax.jit, static_argnames=("batch_tile",))
def fcdp_forward(x, prepared, *, batch_tile=2048):
    """x: (B, input_dim) float32. prepared = prepare_params(...). Returns (B, action_dim)."""
    w1, b1, w2, b2, w3, b3, scale, offset = prepared
    B, input_dim = x.shape
    h1 = w1.shape[1]
    h2 = w2.shape[1]
    action_dim = w3.shape[1]

    # Batch tile: large enough to amortize per-grid-step overhead, but split into at
    # least two tiles when possible so the "parallel" batch axis uses both TCs on v7x.
    half = -(-B // 2)                         # cdiv(B, 2)
    tb = min(batch_tile, _round_up(half, 8))
    if tb >= B:
        tb = B                                # single tile covering the whole batch
    grid = (pl.cdiv(B, tb),)

    const2d = lambda i: (0, 0)                # params: DMA'd once, VMEM-resident
    batch_map = lambda i: (i, 0)              # x / out: tiled over batch

    flops = 2 * B * (input_dim * h1 + h1 * h2 + h2 * action_dim)
    bytes_accessed = 4 * (B * input_dim + B * action_dim
                          + w1.size + b1.size + w2.size + b2.size
                          + w3.size + b3.size + scale.size + offset.size)
    transcendentals = B * action_dim

    return pl.pallas_call(
        fcdp_kernel,
        out_shape=jax.ShapeDtypeStruct((B, action_dim), jnp.float32),
        grid=grid,
        in_specs=[
            pl.BlockSpec((tb, input_dim), batch_map),     # x
            pl.BlockSpec((input_dim, h1), const2d),       # w1
            pl.BlockSpec((1, h1), const2d),               # b1
            pl.BlockSpec((h1, h2), const2d),              # w2
            pl.BlockSpec((1, h2), const2d),               # b2
            pl.BlockSpec((h2, action_dim), const2d),      # w3
            pl.BlockSpec((1, action_dim), const2d),       # b3
            pl.BlockSpec((1, action_dim), const2d),       # scale
            pl.BlockSpec((1, action_dim), const2d),       # offset
        ],
        out_specs=pl.BlockSpec((tb, action_dim), batch_map),
        compiler_params=pltpu.CompilerParams(
            dimension_semantics=("parallel",),
            vmem_limit_bytes=32 * 1024 * 1024),
        cost_estimate=pl.CostEstimate(
            flops=flops,
            transcendentals=transcendentals,
            bytes_accessed=bytes_accessed),
    )(x, w1, b1, w2, b2, w3, b3, scale, offset)


def init_params(key, input_dim, hidden_dims, action_dim):
    """Deterministic init mimicking nn.Linear default (uniform +/- 1/sqrt(fan_in)).
    Weights are stored transposed: (in, out)."""
    dims = [input_dim] + list(hidden_dims) + [action_dim]
    params = []
    for i in range(len(dims) - 1):
        fan_in, fan_out = dims[i], dims[i + 1]
        key, kw, kb = jax.random.split(key, 3)
        bound = 1.0 / jnp.sqrt(jnp.float32(fan_in))
        w = jax.random.uniform(kw, (fan_in, fan_out), jnp.float32, -bound, bound)
        b = jax.random.uniform(kb, (1, fan_out), jnp.float32, -bound, bound)
        params.extend([w, b])
    return tuple(params)


def fcdp_ref(x, params, env_min, env_max):
    """Pure-JAX reference mirroring the PyTorch module."""
    w1, b1, w2, b2, w3, b3 = params
    h = jnp.maximum(x @ w1 + b1, 0.0)
    h = jnp.maximum(h @ w2 + b2, 0.0)
    a = jnp.tanh(h @ w3 + b3)
    nn_min, nn_max = -1.0, 1.0
    return (a - nn_min) * (env_max - env_min) / (nn_max - nn_min) + env_min


# TODO(synk): the module's _format() (numpy -> tensor conversion, unsqueeze, device
# placement) is host-side plumbing with no kernel equivalent; callers pass a (B, D) array.

if __name__ == "__main__":
    key = jax.random.PRNGKey(0)

    batch = 2
    input_dim = 8          # state dimension
    hidden_dims = (32, 32)
    action_dim = 2         # len(env_max)

    env_min = jnp.array([-1.0, -0.5], dtype=jnp.float32)
    env_max = jnp.array([1.0, 0.5], dtype=jnp.float32)

    key, kx, kp = jax.random.split(key, 3)
    x = jax.random.normal(kx, (batch, input_dim), dtype=jnp.float32)
    params = init_params(kp, input_dim, hidden_dims, action_dim)
    prepared = prepare_params(params, env_min, env_max)

    # small-batch case (single tile, grid=(1,))
    out = jax.block_until_ready(fcdp_forward(x, prepared))
    ref = fcdp_ref(x, params, env_min, env_max)
    assert out.shape == (batch, action_dim)
    assert jnp.allclose(out, ref, atol=1e-5, rtol=1e-5), (out, ref)

    # mid-size batch: tb=512, grid=(2,) -> both TensorCores on v7x
    key, kx2 = jax.random.split(key)
    x_mid = jax.random.normal(kx2, (1024, input_dim), dtype=jnp.float32)
    out_mid = jax.block_until_ready(fcdp_forward(x_mid, prepared))
    assert out_mid.shape == (1024, action_dim)
    assert jnp.allclose(out_mid, fcdp_ref(x_mid, params, env_min, env_max),
                        atol=1e-5, rtol=1e-5)

    # large batch with a ragged tail: tb=2048, grid=(3,), partial last tile
    key, kx3 = jax.random.split(key)
    x_big = jax.random.normal(kx3, (5000, input_dim), dtype=jnp.float32)
    out_big = jax.block_until_ready(fcdp_forward(x_big, prepared))
    assert out_big.shape == (5000, action_dim)
    assert jnp.allclose(out_big, fcdp_ref(x_big, params, env_min, env_max),
                        atol=1e-5, rtol=1e-5)

    print("KERNEL_OK")
</pallas_src>

<mosaic_0001>
module attributes {stable_mosaic.version = 11 : i64} {
  func.func @fcdp_kernel(%arg0: i32, %arg1: memref<2x8xf32, #tpu.memory_space<vmem>>, %arg2: memref<8x32xf32, #tpu.memory_space<vmem>>, %arg3: memref<1x32xf32, #tpu.memory_space<vmem>>, %arg4: memref<32x32xf32, #tpu.memory_space<vmem>>, %arg5: memref<1x32xf32, #tpu.memory_space<vmem>>, %arg6: memref<32x2xf32, #tpu.memory_space<vmem>>, %arg7: memref<1x2xf32, #tpu.memory_space<vmem>>, %arg8: memref<1x2xf32, #tpu.memory_space<vmem>>, %arg9: memref<1x2xf32, #tpu.memory_space<vmem>>, %arg10: memref<2x2xf32, #tpu.memory_space<vmem>>) attributes {dimension_semantics = [#tpu.dimension_semantics<parallel>], iteration_bounds = array<i64: 1>, scalar_prefetch = 0 : i64, scratch_operands = 0 : i64, tpu.core_type = #tpu.core_type<tc>, window_params = [{transform_indices = @transform_0, window_bounds = array<i64: 2, 8>}, {pipeline_mode = #tpu.pipeline_mode<synchronous>, transform_indices = @transform_1, window_bounds = array<i64: 8, 32>}, {pipeline_mode = #tpu.pipeline_mode<synchronous>, transform_indices = @transform_2, window_bounds = array<i64: 1, 32>}, {pipeline_mode = #tpu.pipeline_mode<synchronous>, transform_indices = @transform_3, window_bounds = array<i64: 32, 32>}, {pipeline_mode = #tpu.pipeline_mode<synchronous>, transform_indices = @transform_4, window_bounds = array<i64: 1, 32>}, {pipeline_mode = #tpu.pipeline_mode<synchronous>, transform_indices = @transform_5, window_bounds = array<i64: 32, 2>}, {pipeline_mode = #tpu.pipeline_mode<synchronous>, transform_indices = @transform_6, window_bounds = array<i64: 1, 2>}, {pipeline_mode = #tpu.pipeline_mode<synchronous>, transform_indices = @transform_7, window_bounds = array<i64: 1, 2>}, {pipeline_mode = #tpu.pipeline_mode<synchronous>, transform_indices = @transform_8, window_bounds = array<i64: 1, 2>}, {transform_indices = @transform_9, window_bounds = array<i64: 2, 2>}]} {
    %c0 = arith.constant 0 : index
    %c0_0 = arith.constant 0 : index
    %0 = vector.load %arg1[%c0, %c0_0] : memref<2x8xf32, #tpu.memory_space<vmem>>, vector<2x8xf32>
    %c0_1 = arith.constant 0 : index
    %c0_2 = arith.constant 0 : index
    %1 = vector.load %arg2[%c0_1, %c0_2] : memref<8x32xf32, #tpu.memory_space<vmem>>, vector<8x32xf32>
    %cst = arith.constant dense<0.000000e+00> : vector<2x32xf32>
    %2 = tpu.matmul %0, %1, %cst {dimension_numbers = #tpu.dot_dimension_numbers<[1], [0], [0], [1], [0, 0, 1, 1], [], []>} : vector<2x8xf32>, vector<8x32xf32>, vector<2x32xf32> -> vector<2x32xf32>
    %c0_3 = arith.constant 0 : index
    %c0_4 = arith.constant 0 : index
    %3 = vector.load %arg3[%c0_3, %c0_4] : memref<1x32xf32, #tpu.memory_space<vmem>>, vector<1x32xf32>
    %4 = vector.broadcast %3 : vector<1x32xf32> to vector<2x32xf32>
    %5 = arith.addf %2, %4 : vector<2x32xf32>
    %cst_5 = arith.constant 0.000000e+00 : f32
    %6 = vector.broadcast %cst_5 : f32 to vector<2x32xf32>
    %7 = arith.maximumf %5, %6 : vector<2x32xf32>
    %c0_6 = arith.constant 0 : index
    %c0_7 = arith.constant 0 : index
    %8 = vector.load %arg4[%c0_6, %c0_7] : memref<32x32xf32, #tpu.memory_space<vmem>>, vector<32x32xf32>
    %cst_8 = arith.constant dense<0.000000e+00> : vector<2x32xf32>
    %9 = tpu.matmul %7, %8, %cst_8 {dimension_numbers = #tpu.dot_dimension_numbers<[1], [0], [0], [1], [0, 0, 1, 1], [], []>} : vector<2x32xf32>, vector<32x32xf32>, vector<2x32xf32> -> vector<2x32xf32>
    %c0_9 = arith.constant 0 : index
    %c0_10 = arith.constant 0 : index
    %10 = vector.load %arg5[%c0_9, %c0_10] : memref<1x32xf32, #tpu.memory_space<vmem>>, vector<1x32xf32>
    %11 = vector.broadcast %10 : vector<1x32xf32> to vector<2x32xf32>
    %12 = arith.addf %9, %11 : vector<2x32xf32>
    %cst_11 = arith.constant 0.000000e+00 : f32
    %13 = vector.broadcast %cst_11 : f32 to vector<2x32xf32>
    %14 = arith.maximumf %12, %13 : vector<2x32xf32>
    %c0_12 = arith.constant 0 : index
    %c0_13 = arith.constant 0 : index
    %15 = vector.load %arg6[%c0_12, %c0_13] : memref<32x2xf32, #tpu.memory_space<vmem>>, vector<32x2xf32>
    %cst_14 = arith.constant dense<0.000000e+00> : vector<2x2xf32>
    %16 = tpu.matmul %14, %15, %cst_14 {dimension_numbers = #tpu.dot_dimension_numbers<[1], [0], [0], [1], [0, 0, 1, 1], [], []>} : vector<2x32xf32>, vector<32x2xf32>, vector<2x2xf32> -> vector<2x2xf32>
    %c0_15 = arith.constant 0 : index
    %c0_16 = arith.constant 0 : index
    %17 = vector.load %arg7[%c0_15, %c0_16] : memref<1x2xf32, #tpu.memory_space<vmem>>, vector<1x2xf32>
    %18 = vector.broadcast %17 : vector<1x2xf32> to vector<2x2xf32>
    %19 = arith.addf %16, %18 : vector<2x2xf32>
    %20 = math.tanh %19 : vector<2x2xf32>
    %c0_17 = arith.constant 0 : index
    %c0_18 = arith.constant 0 : index
    %21 = vector.load %arg8[%c0_17, %c0_18] : memref<1x2xf32, #tpu.memory_space<vmem>>, vector<1x2xf32>
    %22 = vector.broadcast %21 : vector<1x2xf32> to vector<2x2xf32>
    %23 = arith.mulf %20, %22 : vector<2x2xf32>
    %c0_19 = arith.constant 0 : index
    %c0_20 = arith.constant 0 : index
    %24 = vector.load %arg9[%c0_19, %c0_20] : memref<1x2xf32, #tpu.memory_space<vmem>>, vector<1x2xf32>
    %25 = vector.broadcast %24 : vector<1x2xf32> to vector<2x2xf32>
    %26 = arith.addf %23, %25 : vector<2x2xf32>
    %c0_21 = arith.constant 0 : index
    %c0_22 = arith.constant 0 : index
    %27 = vector.load %arg10[%c0_21, %c0_22] : memref<2x2xf32, #tpu.memory_space<vmem>>, vector<2x2xf32>
    tpu.vector_store %arg10[%c0_21, %c0_22], %26 {strides = array<i32>} : memref<2x2xf32, #tpu.memory_space<vmem>>, vector<2x2xf32>,
    return
  }
  func.func @transform_0(%arg0: i32) -> (i32, i32) {
    %c0_i32 = arith.constant 0 : i32
    %c0_i32_0 = arith.constant 0 : i32
    return %arg0, %c0_i32 : i32, i32
  }
  func.func @transform_1(%arg0: i32) -> (i32, i32) {
    %c0_i32 = arith.constant 0 : i32
    %c0_i32_0 = arith.constant 0 : i32
    %c0_i32_1 = arith.constant 0 : i32
    return %c0_i32, %c0_i32_0 : i32, i32
  }
  func.func @transform_2(%arg0: i32) -> (i32, i32) {
    %c0_i32 = arith.constant 0 : i32
    %c0_i32_0 = arith.constant 0 : i32
    %c0_i32_1 = arith.constant 0 : i32
    return %c0_i32, %c0_i32_0 : i32, i32
  }
  func.func @transform_3(%arg0: i32) -> (i32, i32) {
    %c0_i32 = arith.constant 0 : i32
    %c0_i32_0 = arith.constant 0 : i32
    %c0_i32_1 = arith.constant 0 : i32
    return %c0_i32, %c0_i32_0 : i32, i32
  }
  func.func @transform_4(%arg0: i32) -> (i32, i32) {
    %c0_i32 = arith.constant 0 : i32
    %c0_i32_0 = arith.constant 0 : i32
    %c0_i32_1 = arith.constant 0 : i32
    return %c0_i32, %c0_i32_0 : i32, i32
  }
  func.func @transform_5(%arg0: i32) -> (i32, i32) {
    %c0_i32 = arith.constant 0 : i32
    %c0_i32_0 = arith.constant 0 : i32
    %c0_i32_1 = arith.constant 0 : i32
    return %c0_i32, %c0_i32_0 : i32, i32
  }
  func.func @transform_6(%arg0: i32) -> (i32, i32) {
    %c0_i32 = arith.constant 0 : i32
    %c0_i32_0 = arith.constant 0 : i32
    %c0_i32_1 = arith.constant 0 : i32
    return %c0_i32, %c0_i32_0 : i32, i32
  }
  func.func @transform_7(%arg0: i32) -> (i32, i32) {
    %c0_i32 = arith.constant 0 : i32
    %c0_i32_0 = arith.constant 0 : i32
    %c0_i32_1 = arith.constant 0 : i32
    return %c0_i32, %c0_i32_0 : i32, i32
  }
  func.func @transform_8(%arg0: i32) -> (i32, i32) {
    %c0_i32 = arith.constant 0 : i32
    %c0_i32_0 = arith.constant 0 : i32
    %c0_i32_1 = arith.constant 0 : i32
    return %c0_i32, %c0_i32_0 : i32, i32
  }
  func.func @transform_9(%arg0: i32) -> (i32, i32) {
    %c0_i32 = arith.constant 0 : i32
    %c0_i32_0 = arith.constant 0 : i32
    return %arg0, %c0_i32 : i32, i32
  }
}

</mosaic_0001>

<bundles_post_ra>
// kernel: fcdp_forward.1
= control target key start
LH: loop header
LB: loop body
LE: loop exit
PB: predicated region body
PF: predicated region fallthrough
CT: control target
= control target key end

     0   :  { %14 = vsyncpa [#allocation3], 0  ;;  %s534_s0 = inlined_call_operand.vmem [shape: f32[2,8], index: 0, kind: input, shape index: {}]   ;;  %s535_s1 = inlined_call_operand.hbm [shape: f32[8,32], index: 1, kind: input, shape index: {}]   ;;  %s536_s2 = inlined_call_operand.vmem [shape: f32[1,32], index: 2, kind: input, shape index: {}]   ;;  %s537_s3 = inlined_call_operand.vmem [shape: f32[32,32], index: 3, kind: input, shape index: {}]   ;;  %s538_s4 = inlined_call_operand.vmem [shape: f32[1,32], index: 4, kind: input, shape index: {}]   ;;  %s539_s5 = inlined_call_operand.vmem [shape: f32[32,2], index: 5, kind: input, shape index: {}]   ;;  %s540_s6 = inlined_call_operand.vmem [shape: f32[1,2], index: 6, kind: input, shape index: {}]   ;;  %s541_s7 = inlined_call_operand.vmem [shape: f32[1,2], index: 7, kind: input, shape index: {}]   ;;  %s542_s8 = inlined_call_operand.vmem [shape: f32[1,2], index: 8, kind: input, shape index: {}]   ;;  %s543_s9 = inlined_call_operand.hbm [shape: f32[2,2], index: 9, kind: output, shape index: {}]  }
   0x1   :  { %15 = vsyncpa [#allocation4], 0  ;;  %s430_s30 = smov [#allocation2]  }
   0x2   :  { %s24_s10 = sshll.u32 %s430_s30, 4  ;;  %s25_s10 = int_to_ptr.vmem [resolvable:$true] %s24_s10 }
   0x3   :  { %s394_s11 = scalar_lea.vmem %s25_s10, 128  ;;  %p399_p1 = scmp.lt.s32.totalorder %s25_s10, %s25_s10 }
   0x4   :  { %p395_p0 = scmp.ne.s32.totalorder %s25_s10, %s394_s11  ;;  %p400_p2 = scmp.lt.s32.totalorder %s394_s11, %s394_s11 }
   0x6   :  { %p401_p3 = por %p400_p2, %p399_p1 }
   0x8   :  { %p402_p4 = pnand %p401_p3, %p395_p0 }
   0xa   :  { %405 = shalt.err (!%p402_p4)
}
   0xb   :  { %27 = dma.hbm_to_vmem [thread:$0]  %s535_s1, 128, %s25_s10, [#allocation3]  }
   0xc   :  { %426 = dma.done.wait [#allocation3], 128  }
   0xd   :  { %427 = vsyncadd [#allocation3], 4294967168  ;;  %v431_v0 = vmov 0.0   ;;  %vm432_vm0 = vmmov 0   ;;  %vm54_vm1 = vcmask 64512   ;;  %v46_v1 = vld [vmem:[#allocation2] sm:$0xff] }
   0xe   :  { %353 = vmatprep.subr.mxu0 %v431_v0  ;;  %355 = vmatprep.mubr.msk.f32.mxu0 %vm432_vm0, %v431_v0  ;;  %v45_v2 = vld [vmem:[%s534_s0] sm:$0x3]  ;;  %v132_v3 = vld [vmem:[%s537_s3 + $0x18] sm:$0xff]  ;;  %v131_v4 = vld [vmem:[%s537_s3 + $0x10] sm:$0xff]  ;;  %vm140_vm2 = vcmask 261120   ;;  %s433_s15 = smov [#allocation5]  }
   0xf   :  { %358 = vmatprep.subr.mxu1 %v431_v0  ;;  %366 = vmatprep.mubr.msk.f32.mxu1 %vm432_vm0, %v431_v0  ;;  %v130_v5 = vld [vmem:[%s537_s3 + $0x8] sm:$0xff]  ;;  %v129_v6 = vld [vmem:[%s537_s3] sm:$0xff]  ;;  %v218_v7 = vld [vmem:[%s539_s5 + $0x18] sm:$0xff]  ;;  %s324_s16 = sshll.u32 %s433_s15, 4  ;;  %vm316_vm3 = vcmask 9216   ;;  %s325_s16 = int_to_ptr.vmem [resolvable:$true] %s324_s16 }
  0x10   :  { %354 = vmatpush3.msra.mxu0 %v46_v1  ;;  %359 = vmatpush3.msra.mxu1 %v132_v3  ;;  %v333_v8 = vld [vmem:[%s536_s2] ss:$0 sm:$0xff]  ;;  %v217_v13 = vld [vmem:[%s539_s5 + $0x10] sm:$0xff]  ;;  %v216_v14 = vld [vmem:[%s539_s5 + $0x8] sm:$0xff]  ;;  %p411_p6 = scmp.lt.s32.totalorder %s325_s16, %s325_s16 }
  0x11   :  { %356 = vmatmul.mubr.msk.f32.vlgmr.msra.gmra.mxu0 %vm54_vm1, %v45_v2  ;;  %360 = vmatprep.subr.mxu1 %v431_v0  ;;  %v215_v15 = vld [vmem:[%s539_s5] sm:$0xff] }
  0x12   :  { %369 = vmatprep.subr.mxu0 %v431_v0  ;;  %377 = vmatprep.mubr.msk.f32.mxu0 %vm432_vm0, %v431_v0  ;;  %v335_v16 = vld [vmem:[%s538_s4] ss:$0 sm:$0xff] }
  0x13   :  { %361 = vmatpush3.msra.mxu1 %v131_v4  ;;  %370 = vmatpush3.msra.mxu0 %v218_v7  ;;  %v337_v21 = vld [vmem:[%s540_s6] ss:$0 sm:$0xff]  ;;  %s406_s6 = scalar_lea.vmem %s325_s16, 32 }
  0x14   :  { %362 = vmatprep.subr.mxu1 %v431_v0  ;;  %371 = vmatprep.subr.mxu0 %v431_v0  ;;  %v339_v25 = vld [vmem:[%s541_s7] ss:$0 sm:$0xff]  ;;  %p407_p5 = scmp.ne.s32.totalorder %s325_s16, %s406_s6  ;;  %p412_p7 = scmp.lt.s32.totalorder %s406_s6, %s406_s6 }
  0x15   :  { %363 = vmatpush3.msra.mxu1 %v130_v5  ;;  %372 = vmatpush3.msra.mxu0 %v217_v13  ;;  %v340_v27 = vld [vmem:[%s542_s8] ss:$0 sm:$0xff] }
  0x16   :  { %364 = vmatprep.subr.mxu1 %v431_v0  ;;  %373 = vmatprep.subr.mxu0 %v431_v0  ;;  %p413_p8 = por %p412_p7, %p411_p6 }
  0x17   :  { %365 = vmatpush3.msra.mxu1 %v129_v6  ;;  %374 = vmatpush3.msra.mxu0 %v216_v14 }
  0x18   :  { %375 = vmatprep.subr.mxu0 %v431_v0  ;;  %p414_p9 = pnand %p413_p8, %p407_p5 }
  0x19   :  { %376 = vmatpush3.msra.mxu0 %v215_v15 }
  0xd1   :  { %v124_v9 = vpop.f32.mrf.mxu0 }
  0xd2   :  { %v125_v10 = vadd.f32 %v333_v8, %v124_v9 }
  0xd3   :  { %v357_v11 = vpop.f32.mrf.mxu0 }
  0xd4   :  { %v128_v12 = vmax.f32 %v125_v10, 0.0 }
  0xd6   :  { %367 = vmatmul.mubr.msk.f32.vlgmr.msra.gmra.mxu1 %vm140_vm2, %v128_v12 }
 0x196   :  { %v210_v17 = vpop.f32.mrf.mxu1 }
 0x197   :  { %v211_v18 = vadd.f32 %v335_v16, %v210_v17 }
 0x198   :  { %v368_v19 = vpop.f32.mrf.mxu1 }
 0x199   :  { %v214_v20 = vmax.f32 %v211_v18, 0.0 }
 0x19b   :  { %378 = vmatmul.mubr.msk.f32.vlgmr.msra.gmra.mxu0 %vm140_vm2, %v214_v20 }
 0x25b   :  { %v295_v22 = vpop.f32.mrf.mxu0 }
 0x25c   :  { %v296_v23 = vadd.f32 %v337_v21, %v295_v22 }
 0x25d   :  { %v379_v24 = vpop.f32.mrf.mxu0 }
 0x25e   :  { %384 = vtanh.f32 %v296_v23 }
 0x26b   :  { %v385_v26 = vpop.eup %384 }
 0x26c   :  { %v307_v28 = vmul.f32 %v385_v26, %v339_v25 }
 0x26e   :  { %v315_v29 = vadd.f32 %v340_v27, %v307_v28 }
 0x270   :  { %317 = vst.msk [vmem:[#allocation5] sm:$0x3] %vm316_vm3, %v315_v29 }
 0x271   :  { %417 = shalt.err (!%p414_p9)
}
 0x272   :  { %327 = dma.vmem_to_hbm [thread:$0]  %s325_s16, 32, %s543_s9, [#allocation4]  }
 0x273   :  { %428 = dma.done.wait [#allocation4], 32  }
 0x274   :  { %429 = vsyncadd [#allocation4], 4294967264 }
 0x275   :  { %331 = vsyncpa [#allocation3], 1 }
 0x276   :  { %332 = vsyncpa [#allocation4], 1 }

</bundles_post_ra>
